<compile_context>
chip_gen: v6e
topology: v6e:2x2x1
jax: 0.10.0
libtpu: 0.0.40
codegen_flags: <defaults>
</compile_context>

<pallas_src>
import functools

import numpy as np
import jax
import jax.numpy as jnp
from jax.experimental import pallas as pl
from jax.experimental.pallas import tpu as pltpu


def _vmem_limit_bytes():
    # Cap scoped VMEM well under the physical budget (64 MiB/TC on v7x, 128 MiB on v5e/v6e).
    cap = 64 * 1024 * 1024
    try:
        info = pltpu.get_tpu_info()
        c = getattr(info, "vmem_capacity_bytes", None)
        if c:
            cap = int(c)
    except Exception:
        pass
    return int(min(cap * 3 // 4, 96 * 1024 * 1024))


_VMEM_LIMIT = _vmem_limit_bytes()
_LANE = 128


def _row_tile(m):
    # Prefer tiles that give >= 2 grid steps so the input DMA pipelines behind compute.
    for t in (256, 128, 64, 32, 16, 8):
        if m % t == 0 and m // t >= 2:
            return t
    return m


def _dw_row_tile(h):
    for t in (8, 4):
        if h % t == 0 and h // t >= 2:
            return t
    return h


# ----------------------------------------------------------------------------
# Pallas kernel builders (cached per shape so compiled executables are reused)
# ----------------------------------------------------------------------------
@functools.lru_cache(maxsize=None)
def _matmul_fn(M, K, N, has_bias):
    tm = _row_tile(M)
    assert M % tm == 0

    if has_bias:
        def kernel(x_ref, w_ref, b_ref, o_ref):
            acc = jnp.dot(x_ref[...], w_ref[...], preferred_element_type=jnp.float32)
            o_ref[...] = (acc + b_ref[...]).astype(o_ref.dtype)
        in_specs = [pl.BlockSpec((tm, K), lambda i: (i, 0)),
                    pl.BlockSpec((K, N), lambda i: (0, 0)),
                    pl.BlockSpec((1, N), lambda i: (0, 0))]
    else:
        def kernel(x_ref, w_ref, o_ref):
            o_ref[...] = jnp.dot(x_ref[...], w_ref[...],
                                 preferred_element_type=jnp.float32).astype(o_ref.dtype)
        in_specs = [pl.BlockSpec((tm, K), lambda i: (i, 0)),
                    pl.BlockSpec((K, N), lambda i: (0, 0))]

    return jax.jit(pl.pallas_call(
        kernel,
        out_shape=jax.ShapeDtypeStruct((M, N), jnp.bfloat16),
        grid=(M // tm,),
        in_specs=in_specs,
        out_specs=pl.BlockSpec((tm, N), lambda i: (i, 0)),
        compiler_params=pltpu.CompilerParams(
            dimension_semantics=("parallel",), vmem_limit_bytes=_VMEM_LIMIT),
    ))


@functools.lru_cache(maxsize=None)
def _layernorm_fn(M, C):
    tm = _row_tile(M)
    assert M % tm == 0

    def kernel(x_ref, w_ref, b_ref, o_ref):
        x = x_ref[...].astype(jnp.float32)
        mu = jnp.mean(x, axis=-1, keepdims=True)
        var = jnp.mean(jnp.square(x - mu), axis=-1, keepdims=True)
        y = (x - mu) * jax.lax.rsqrt(var + 1e-6) * w_ref[...] + b_ref[...]
        o_ref[...] = y.astype(o_ref.dtype)

    return jax.jit(pl.pallas_call(
        kernel,
        out_shape=jax.ShapeDtypeStruct((M, C), jnp.bfloat16),
        grid=(M // tm,),
        in_specs=[pl.BlockSpec((tm, C), lambda i: (i, 0)),
                  pl.BlockSpec((1, C), lambda i: (0, 0)),
                  pl.BlockSpec((1, C), lambda i: (0, 0))],
        out_specs=pl.BlockSpec((tm, C), lambda i: (i, 0)),
        compiler_params=pltpu.CompilerParams(
            dimension_semantics=("parallel",), vmem_limit_bytes=_VMEM_LIMIT),
    ))


@functools.lru_cache(maxsize=None)
def _cnext_mlp_fn(M, C, H4):
    """Fused ConvNeXt token block: LN -> fc1 -> GELU -> fc2 -> gamma * . + residual.

    Un-chunked: at C<=768 the combined bf16 fc1+fc2 weights (~9.4 MiB) fit even the
    v7x scoped-VMEM cap double-buffered, so the whole block is ONE grid step per
    row tile (no accumulator scratch, no extra grid axis).
    """
    tm = _row_tile(M)
    assert M % tm == 0

    def kernel(t_ref, res_ref, lnw_ref, lnb_ref, w1_ref, b1_ref, w2_ref, b2_ref,
               g_ref, o_ref):
        t = t_ref[...].astype(jnp.float32)
        mu = jnp.mean(t, axis=-1, keepdims=True)
        var = jnp.mean(jnp.square(t - mu), axis=-1, keepdims=True)
        hn = (t - mu) * jax.lax.rsqrt(var + 1e-6) * lnw_ref[...] + lnb_ref[...]
        a = jnp.dot(hn.astype(jnp.bfloat16), w1_ref[...],
                    preferred_element_type=jnp.float32) + b1_ref[...]
        a = jax.nn.gelu(a, approximate=True)
        y = jnp.dot(a.astype(jnp.bfloat16), w2_ref[...],
                    preferred_element_type=jnp.float32) + b2_ref[...]
        y = res_ref[...].astype(jnp.float32) + g_ref[...] * y
        o_ref[...] = y.astype(o_ref.dtype)

    return jax.jit(pl.pallas_call(
        kernel,
        out_shape=jax.ShapeDtypeStruct((M, C), jnp.bfloat16),
        grid=(M // tm,),
        in_specs=[pl.BlockSpec((tm, C), lambda i: (i, 0)),   # dwconv output (tokens, bf16)
                  pl.BlockSpec((tm, C), lambda i: (i, 0)),   # residual (bf16)
                  pl.BlockSpec((1, C), lambda i: (0, 0)),    # ln weight (f32)
                  pl.BlockSpec((1, C), lambda i: (0, 0)),    # ln bias (f32)
                  pl.BlockSpec((C, H4), lambda i: (0, 0)),   # fc1 weight (bf16)
                  pl.BlockSpec((1, H4), lambda i: (0, 0)),   # fc1 bias (f32)
                  pl.BlockSpec((H4, C), lambda i: (0, 0)),   # fc2 weight (bf16)
                  pl.BlockSpec((1, C), lambda i: (0, 0)),    # fc2 bias (f32)
                  pl.BlockSpec((1, C), lambda i: (0, 0))],   # layer scale gamma (f32)
        out_specs=pl.BlockSpec((tm, C), lambda i: (i, 0)),
        compiler_params=pltpu.CompilerParams(
            dimension_semantics=("parallel",), vmem_limit_bytes=_VMEM_LIMIT),
    ))


@functools.lru_cache(maxsize=None)
def _dwconv_fn(B, H, W, C, k, dilation, act, th):
    pad = ((k - 1) // 2) * dilation
    Hp, Wp = H + 2 * pad, W + 2 * pad
    R = H // th

    def kernel(x_ref, w_ref, b_ref, o_ref):
        r = pl.program_id(1)
        w = w_ref[...]
        acc = jnp.zeros((th, W, C), jnp.float32)
        base = r * th
        # TODO(synk): per-tap sublane slices could use pltpu.roll (idle XLU slot) or a
        #             C->128 lane pad; kept as plain slices for lowering safety.
        for u in range(k):
            xu = x_ref[0, pl.ds(base + u * dilation, th), :, :].astype(jnp.float32)
            for v in range(k):
                acc = acc + xu[:, v * dilation:v * dilation + W, :] * w[u * k + v, :]
        acc = acc + b_ref[...]
        if act:
            acc = jax.nn.gelu(acc, approximate=True)
        o_ref[0] = acc.astype(o_ref.dtype)

    return jax.jit(pl.pallas_call(
        kernel,
        out_shape=jax.ShapeDtypeStruct((B, H, W, C), jnp.bfloat16),
        grid=(B, R),
        in_specs=[pl.BlockSpec((1, Hp, Wp, C), lambda b, r: (b, 0, 0, 0)),
                  pl.BlockSpec((k * k, C), lambda b, r: (0, 0)),
                  pl.BlockSpec((1, C), lambda b, r: (0, 0))],
        out_specs=pl.BlockSpec((1, th, W, C), lambda b, r: (b, r, 0, 0)),
        compiler_params=pltpu.CompilerParams(
            dimension_semantics=("parallel", "parallel"), vmem_limit_bytes=_VMEM_LIMIT),
    ))


@functools.lru_cache(maxsize=None)
def _kron_resize_fn(B, HW, C, OHOW):
    # Fused bilinear resize: out[b] = kron(Wh, Ww) @ x[b]  with x flattened to (HW, C).
    def kernel(m_ref, x_ref, o_ref):
        o_ref[0] = jnp.dot(m_ref[...], x_ref[0],
                           preferred_element_type=jnp.float32).astype(o_ref.dtype)

    return jax.jit(pl.pallas_call(
        kernel,
        out_shape=jax.ShapeDtypeStruct((B, OHOW, C), jnp.bfloat16),
        grid=(B,),
        in_specs=[pl.BlockSpec((OHOW, HW), lambda b: (0, 0)),
                  pl.BlockSpec((1, HW, C), lambda b: (b, 0, 0))],
        out_specs=pl.BlockSpec((1, OHOW, C), lambda b: (b, 0, 0)),
        compiler_params=pltpu.CompilerParams(
            dimension_semantics=("parallel",), vmem_limit_bytes=_VMEM_LIMIT),
    ))


@functools.lru_cache(maxsize=None)
def _ra_fn(B, H, W, C, NC):
    def kernel(f_ref, p_ref, g_ref, o_ref):
        rev = 1.0 - jax.nn.sigmoid(
            jnp.mean(p_ref[...].astype(jnp.float32), axis=-1, keepdims=True))
        o_ref[...] = (f_ref[...].astype(jnp.float32) * rev * g_ref[...]).astype(o_ref.dtype)

    return jax.jit(pl.pallas_call(
        kernel,
        out_shape=jax.ShapeDtypeStruct((B, H, W, C), jnp.bfloat16),
        grid=(B,),
        in_specs=[pl.BlockSpec((1, H, W, C), lambda b: (b, 0, 0, 0)),
                  pl.BlockSpec((1, H, W, NC), lambda b: (b, 0, 0, 0)),
                  pl.BlockSpec((1, H, W, 1), lambda b: (b, 0, 0, 0))],
        out_specs=pl.BlockSpec((1, H, W, C), lambda b: (b, 0, 0, 0)),
        compiler_params=pltpu.CompilerParams(
            dimension_semantics=("parallel",), vmem_limit_bytes=_VMEM_LIMIT),
    ))


# ----------------------------------------------------------------------------
# Layer wrappers (glue: reshapes / padding / im2col; compute happens in Pallas)
# ----------------------------------------------------------------------------
def pallas_matmul(x, w, b=None):
    """(M,K)x(K,N)(+b) in bf16 with f32 accumulation; N lane-padded to 128 multiples."""
    M, K = x.shape
    N = w.shape[1]
    npad = (-N) % _LANE
    if npad:
        w = jnp.pad(w, ((0, 0), (0, npad)))
        if b is not None:
            b = jnp.pad(b, (0, npad))
    Np = N + npad
    x = x.astype(jnp.bfloat16)
    w = w.astype(jnp.bfloat16)
    if b is None:
        y = _matmul_fn(M, K, Np, False)(x, w)
    else:
        y = _matmul_fn(M, K, Np, True)(x, w, b.reshape(1, Np).astype(jnp.float32))
    if npad:
        y = y[:, :N]
    return y


def linear(x, p):
    shp = x.shape
    n = p['w'].shape[1]
    y = pallas_matmul(x.reshape(-1, shp[-1]), p['w'], p['b'])
    return y.reshape(shp[:-1] + (n,))


def layernorm(x, p):
    shp = x.shape
    C = shp[-1]
    fn = _layernorm_fn(int(np.prod(shp[:-1])), C)
    return fn(x.reshape(-1, C).astype(jnp.bfloat16),
              p['w'].reshape(1, C), p['b'].reshape(1, C)).reshape(shp)


def conv2d_1x1(x, p):
    return linear(x, p)


def conv2d_im2col(x, p, k, pad, stride=1):
    # TODO(synk): patches now built in bf16 (half the HBM traffic of the f32 version);
    #             fully in-kernel tap accumulation left as future work.
    B, H, W, Cin = x.shape
    xp = jnp.pad(x.astype(jnp.bfloat16), ((0, 0), (pad, pad), (pad, pad), (0, 0)))
    Ho = (H + 2 * pad - k) // stride + 1
    Wo = (W + 2 * pad - k) // stride + 1
    cols = []
    for u in range(k):
        for v in range(k):
            cols.append(xp[:, u:u + stride * Ho:stride, v:v + stride * Wo:stride, :])
    patches = jnp.concatenate(cols, axis=-1).reshape(B * Ho * Wo, k * k * Cin)
    y = pallas_matmul(patches, p['w'], p['b'])
    return y.reshape(B, Ho, Wo, -1)


def dwconv(x, w, b, k, dilation, act=False):
    B, H, W, C = x.shape
    pad = ((k - 1) // 2) * dilation
    xp = jnp.pad(x.astype(jnp.bfloat16), ((0, 0), (pad, pad), (pad, pad), (0, 0)))
    th = _dw_row_tile(H)
    return _dwconv_fn(B, H, W, C, k, dilation, act, th)(xp, w, b.reshape(1, C))


def convnext_block(x, p, k=7, dilation=1):
    B, H, W, C = x.shape
    t = dwconv(x, p['dw_w'], p['dw_b'], k, dilation)
    M = B * H * W
    H4 = 4 * C
    fn = _cnext_mlp_fn(M, C, H4)
    y = fn(t.reshape(M, C), x.reshape(M, C).astype(jnp.bfloat16),
           p['ln']['w'].reshape(1, C), p['ln']['b'].reshape(1, C),
           p['fc1']['w'], p['fc1']['b'].reshape(1, H4),
           p['fc2']['w'], p['fc2']['b'].reshape(1, C),
           p['gamma'].reshape(1, C))
    return y.reshape(B, H, W, C)


@functools.lru_cache(maxsize=None)
def _bilinear_matrix_np(out_size, in_size):
    # PyTorch F.interpolate(mode='bilinear', align_corners=False) source-index formula.
    scale = in_size / out_size
    m = np.zeros((out_size, in_size), np.float32)
    for o in range(out_size):
        src = max((o + 0.5) * scale - 0.5, 0.0)
        i0 = min(int(np.floor(src)), in_size - 1)
        i1 = min(i0 + 1, in_size - 1)
        lam = src - i0
        m[o, i0] += 1.0 - lam
        m[o, i1] += lam
    return m


@functools.lru_cache(maxsize=None)
def _bilinear_matrix(out_size, in_size):
    return jnp.asarray(_bilinear_matrix_np(out_size, in_size))


@functools.lru_cache(maxsize=None)
def _kron_matrix(out_h, in_h, out_w, in_w):
    m = np.kron(_bilinear_matrix_np(out_h, in_h), _bilinear_matrix_np(out_w, in_w))
    return jnp.asarray(m, dtype=jnp.bfloat16)


def resize_bilinear(x, out_h, out_w):
    B, H, W, C = x.shape
    if out_h * out_w * H * W <= (1 << 20):
        # Fused: both axes folded into one kron matrix -> single pallas_call, no transposes.
        m = _kron_matrix(out_h, H, out_w, W)
        fn = _kron_resize_fn(B, H * W, C, out_h * out_w)
        y = fn(m, x.reshape(B, H * W, C).astype(jnp.bfloat16))
        return y.reshape(B, out_h, out_w, C)
    # Large upsamples (class maps): separable 2-pass keeps the interp matrix small.
    Wh = _bilinear_matrix(out_h, H)
    Ww = _bilinear_matrix(out_w, W)
    t = jnp.transpose(x, (1, 0, 2, 3)).reshape(H, B * W * C)
    t = pallas_matmul(Wh, t).reshape(out_h, B, W, C)
    t = jnp.transpose(t, (2, 1, 0, 3)).reshape(W, B * out_h * C)
    t = pallas_matmul(Ww, t).reshape(out_w, B, out_h, C)
    return jnp.transpose(t, (1, 2, 0, 3))


def cfpnext(x, p):
    # TODO(synk): CFPNexT internals inferred: 4 dilated depthwise (k=5) branches,
    # hierarchical fusion, 1x1 projection, LayerNorm, residual.
    outs, acc = [], None
    for i, d in enumerate((1, 3, 5, 9)):
        b = dwconv(x, p['dw_w'][i], p['dw_b'][i], k=5, dilation=d, act=True)
        acc = b if acc is None else acc + b
        outs.append(acc)
    y = jnp.concatenate(outs, axis=-1)
    y = conv2d_1x1(y, p['fuse'])
    y = layernorm(y, p['ln'])
    return x.astype(jnp.bfloat16) + y


def ra_ra(feat, pred, p):
    # TODO(synk): RA_RA definition not provided; implemented as axial-gated reverse attention.
    B, H, W, C = feat.shape
    gate = jax.nn.sigmoid(p['row'][:, None] + p['col'][None, :])
    gate = jnp.broadcast_to(gate[None, :, :, None], (B, H, W, 1)).astype(jnp.float32)
    return _ra_fn(B, H, W, C, pred.shape[-1])(feat.astype(jnp.bfloat16),
                                              pred.astype(jnp.bfloat16), gate)


# ----------------------------------------------------------------------------
# Parameter initialization (deterministic, in-script).  MXU weights stored bf16.
# ----------------------------------------------------------------------------
def init_linear(key, cin, cout):
    return {'w': (0.02 * jax.random.normal(key, (cin, cout), jnp.float32)).astype(jnp.bfloat16),
            'b': jnp.zeros((cout,), jnp.float32)}


def init_conv(key, cin, cout, k):
    return {'w': (0.02 * jax.random.normal(key, (k * k * cin, cout), jnp.float32)).astype(jnp.bfloat16),
            'b': jnp.zeros((cout,), jnp.float32)}


def init_ln(c):
    return {'w': jnp.ones((c,), jnp.float32), 'b': jnp.zeros((c,), jnp.float32)}


def init_cnblock(key, dim, k=7):
    k1, k2, k3 = jax.random.split(key, 3)
    return {'dw_w': 0.02 * jax.random.normal(k1, (k * k, dim), jnp.float32),
            'dw_b': jnp.zeros((dim,), jnp.float32),
            'ln': init_ln(dim),
            'fc1': init_linear(k2, dim, 4 * dim),
            'fc2': init_linear(k3, 4 * dim, dim),
            'gamma': 1e-6 * jnp.ones((dim,), jnp.float32)}


ENC_DIMS = (96, 192, 384, 768)
ENC_DEPTHS = (3, 3, 9, 3)


def init_encoder(key):
    keys = iter(jax.random.split(key, 2 + sum(ENC_DEPTHS) + 3))
    p = {'stem': init_conv(next(keys), 3, ENC_DIMS[0], 4), 'stem_ln': init_ln(ENC_DIMS[0]),
         'stages': [], 'downs': []}
    for si, (d, depth) in enumerate(zip(ENC_DIMS, ENC_DEPTHS)):
        p['stages'].append([init_cnblock(next(keys), d) for _ in range(depth)])
        if si < 3:
            p['downs'].append({'ln': init_ln(d),
                               'conv': init_conv(next(keys), d, ENC_DIMS[si + 1], 2)})
    return p


def init_decoder(key, ch=(96, 192, 384, 768), dim=96, num_classes=4):
    ks = jax.random.split(key, 24)
    p = {'conv1': init_cnblock(ks[0], ch[0]), 'conv2': init_cnblock(ks[1], ch[1]),
         'conv3': init_cnblock(ks[2], ch[2]),
         'upconv3': init_linear(ks[3], ch[3], ch[2]),
         'upconv2': init_linear(ks[4], ch[2], ch[1]),
         'upconv1': init_linear(ks[5], ch[1], ch[0]),
         'dcconv3': init_conv(ks[6], ch[2] * 2, ch[2], 3),
         'dcconv2': init_conv(ks[7], ch[1] * 2, ch[1], 3),
         'dcconv1': init_conv(ks[8], ch[0] * 2, ch[0], 3),
         'conv33': init_cnblock(ks[9], ch[2]), 'conv22': init_cnblock(ks[10], ch[1]),
         'conv11': init_cnblock(ks[11], ch[0]),
         'head3': {'block': init_cnblock(ks[12], ch[2]), 'lin': init_linear(ks[13], ch[2], dim)},
         'head2': {'block': init_cnblock(ks[14], ch[1]), 'lin': init_linear(ks[15], ch[1], dim)},
         'head1': {'block': init_cnblock(ks[16], ch[0]), 'lin': init_linear(ks[17], ch[0], dim)},
         'head': {'conv': init_conv(ks[18], dim * 3, dim, 3),
                  'block': init_cnblock(ks[19], dim),
                  'lin': init_linear(ks[20], dim, num_classes)}}
    return p


def init_cfp(key, dim):
    ks = jax.random.split(key, 6)
    return {'dw_w': [0.02 * jax.random.normal(ks[i], (25, dim), jnp.float32) for i in range(4)],
            'dw_b': [jnp.zeros((dim,), jnp.float32) for _ in range(4)],
            'fuse': init_linear(ks[4], 4 * dim, dim),
            'ln': init_ln(dim)}


def init_refinement(key, dim=96, num_classes=4, hw_list=((16, 16), (8, 8), (4, 4))):
    ks = jax.random.split(key, 16)
    p = {}
    for i, (lvl, (h, w)) in enumerate(zip((1, 2, 3), hw_list)):
        p[f'ra_ra{lvl}'] = {'row': 0.02 * jax.random.normal(ks[i * 3], (h,), jnp.float32),
                            'col': 0.02 * jax.random.normal(ks[i * 3 + 1], (w,), jnp.float32)}
        p[f'cfp{lvl}'] = init_cfp(ks[i * 3 + 2], dim)
        p[f'ra{lvl}_head'] = {'block': init_cnblock(ks[9 + i], dim),
                              'lin': init_linear(ks[12 + i], dim, num_classes)}
    return p


def init_swinformer(key, num_classes=4, img_hw=(64, 64)):
    k1, k2, k3 = jax.random.split(key, 3)
    H, W = img_hw
    hw_list = ((H // 4, W // 4), (H // 8, W // 8), (H // 16, W // 16))
    return {'encoder': init_encoder(k1),
            'decoder': init_decoder(k2, num_classes=num_classes),
            'refine': init_refinement(k3, num_classes=num_classes, hw_list=hw_list)}


# ----------------------------------------------------------------------------
# Forward passes
# ----------------------------------------------------------------------------
def encoder_forward(p, img):
    x = conv2d_im2col(img, p['stem'], k=4, pad=0, stride=4)
    # TODO(synk): stem/downsample LayerNorms are standalone kernels (bf16 in/out); fusing
    #             them into the consuming matmul would need per-token LN on im2col patches.
    x = layernorm(x, p['stem_ln'])
    names = ('feature0', 'feature1', 'feature2', 'bottelneck')
    feats = {}
    for si in range(4):
        for blk in p['stages'][si]:
            x = convnext_block(x, blk)
        feats[names[si]] = x
        if si < 3:
            d = p['downs'][si]
            x = layernorm(x, d['ln'])
            x = conv2d_im2col(x, d['conv'], k=2, pad=0, stride=2)
    return feats


def decoder_forward(p, features):
    feats = {}
    x = features['bottelneck']
    x = resize_bilinear(x, x.shape[1] * 2, x.shape[2] * 2)
    x = conv2d_1x1(x, p['upconv3'])
    x = jnp.concatenate([x, convnext_block(features['feature2'], p['conv3'])], axis=-1)
    x = conv2d_im2col(x, p['dcconv3'], k=3, pad=1)
    x = convnext_block(x, p['conv33'])
    x3 = linear(convnext_block(x, p['head3']['block']), p['head3']['lin'])
    feats['feature3'] = x3
    x3u = resize_bilinear(x3, x3.shape[1] * 8, x3.shape[2] * 8)

    x = resize_bilinear(x, x.shape[1] * 2, x.shape[2] * 2)
    x = conv2d_1x1(x, p['upconv2'])
    x = jnp.concatenate([x, convnext_block(features['feature1'], p['conv2'])], axis=-1)
    x = conv2d_im2col(x, p['dcconv2'], k=3, pad=1)
    x = convnext_block(x, p['conv22'])
    x2 = linear(convnext_block(x, p['head2']['block']), p['head2']['lin'])
    feats['feature2'] = x2
    x2u = resize_bilinear(x2, x2.shape[1] * 4, x2.shape[2] * 4)

    x = resize_bilinear(x, x.shape[1] * 2, x.shape[2] * 2)
    x = conv2d_1x1(x, p['upconv1'])
    x = jnp.concatenate([x, convnext_block(features['feature0'], p['conv1'])], axis=-1)
    x = conv2d_im2col(x, p['dcconv1'], k=3, pad=1)
    x = convnext_block(x, p['conv11'])
    x1 = linear(convnext_block(x, p['head1']['block']), p['head1']['lin'])
    feats['feature1'] = x1
    x1u = resize_bilinear(x1, x1.shape[1] * 2, x1.shape[2] * 2)

    x = jnp.concatenate([x1u, x2u, x3u], axis=-1)
    x = conv2d_im2col(x, p['head']['conv'], k=3, pad=1)
    x = convnext_block(x, p['head']['block'])
    x = linear(x, p['head']['lin'])
    feats['pred'] = x
    targets = resize_bilinear(x, x.shape[1] * 2, x.shape[2] * 2)
    targets = jnp.transpose(targets, (0, 3, 1, 2)).astype(jnp.float32)   # NCHW, like PyTorch
    return targets, feats


def refinement_forward(p, feats):
    preds = {}
    x = feats['pred']
    x = resize_bilinear(x, x.shape[1] // 8, x.shape[2] // 8)          # scale_factor=0.125

    x3 = ra_ra(cfpnext(feats['feature3'], p['cfp3']), x, p['ra_ra3'])
    x3 = linear(convnext_block(x3, p['ra3_head']['block']), p['ra3_head']['lin'])
    x3 = x3 + x
    preds['pred3'] = jnp.transpose(
        resize_bilinear(x3, x3.shape[1] * 16, x3.shape[2] * 16), (0, 3, 1, 2)).astype(jnp.float32)
    x = resize_bilinear(x3, x3.shape[1] * 2, x3.shape[2] * 2)

    x2 = ra_ra(cfpnext(feats['feature2'], p['cfp2']), x, p['ra_ra2'])
    x2 = linear(convnext_block(x2, p['ra2_head']['block']), p['ra2_head']['lin'])
    x2 = x2 + x
    preds['pred2'] = jnp.transpose(
        resize_bilinear(x2, x2.shape[1] * 8, x2.shape[2] * 8), (0, 3, 1, 2)).astype(jnp.float32)
    x = resize_bilinear(x2, x2.shape[1] * 2, x2.shape[2] * 2)

    x1 = ra_ra(cfpnext(feats['feature1'], p['cfp1']), x, p['ra_ra1'])
    x1 = linear(convnext_block(x1, p['ra1_head']['block']), p['ra1_head']['lin'])
    x1 = x1 + x
    preds['pred1'] = jnp.transpose(
        resize_bilinear(x1, x1.shape[1] * 4, x1.shape[2] * 4), (0, 3, 1, 2)).astype(jnp.float32)
    return preds


def swinformer_forward(params, image_nchw):
    img = jnp.transpose(image_nchw, (0, 2, 3, 1)).astype(jnp.bfloat16)   # NCHW -> NHWC, bf16
    enc = encoder_forward(params['encoder'], img)
    targets, f = decoder_forward(params['decoder'], enc)
    p = refinement_forward(params['refine'], f)
    p['dpred'] = targets
    return p


# ----------------------------------------------------------------------------
if __name__ == "__main__":
    NUM_CLASSES = 4
    IMG = 64
    key = jax.random.PRNGKey(0)
    kp, kx = jax.random.split(key)
    params = init_swinformer(kp, num_classes=NUM_CLASSES, img_hw=(IMG, IMG))
    x = jax.random.normal(kx, (2, 3, IMG, IMG), jnp.float32)

    fwd = jax.jit(swinformer_forward)
    out = fwd(params, x)
    jax.block_until_ready(out)

    assert out['dpred'].shape == (2, NUM_CLASSES, IMG, IMG)
    assert out['pred1'].shape == (2, NUM_CLASSES, IMG, IMG)
    assert out['pred2'].shape == (2, NUM_CLASSES, IMG, IMG)
    assert out['pred3'].shape == (2, NUM_CLASSES, IMG, IMG)
    print("KERNEL_OK")
</pallas_src>

<mosaic_0001>
module attributes {stable_mosaic.version = 11 : i64} {
  func.func @kernel(%arg0: i32, %arg1: memref<256x48xbf16, #tpu.memory_space<vmem>>, %arg2: memref<48x128xbf16, #tpu.memory_space<vmem>>, %arg3: memref<1x128xf32, #tpu.memory_space<vmem>>, %arg4: memref<256x128xbf16, #tpu.memory_space<vmem>>) attributes {dimension_semantics = [#tpu.dimension_semantics<parallel>], iteration_bounds = array<i64: 2>, scalar_prefetch = 0 : i64, scratch_operands = 0 : i64, tpu.core_type = #tpu.core_type<tc>, window_params = [{transform_indices = @transform_0, window_bounds = array<i64: 256, 48>}, {pipeline_mode = #tpu.pipeline_mode<synchronous>, transform_indices = @transform_1, window_bounds = array<i64: 48, 128>}, {pipeline_mode = #tpu.pipeline_mode<synchronous>, transform_indices = @transform_2, window_bounds = array<i64: 1, 128>}, {transform_indices = @transform_3, window_bounds = array<i64: 256, 128>}]} {
    %c0 = arith.constant 0 : index
    %c0_0 = arith.constant 0 : index
    %0 = vector.load %arg1[%c0, %c0_0] : memref<256x48xbf16, #tpu.memory_space<vmem>>, vector<256x48xbf16>
    %c0_1 = arith.constant 0 : index
    %c0_2 = arith.constant 0 : index
    %1 = vector.load %arg2[%c0_1, %c0_2] : memref<48x128xbf16, #tpu.memory_space<vmem>>, vector<48x128xbf16>
    %cst = arith.constant dense<0.000000e+00> : vector<256x128xf32>
    %2 = tpu.matmul %0, %1, %cst {dimension_numbers = #tpu.dot_dimension_numbers<[1], [0], [0], [1], [0, 0, 1, 1], [], []>} : vector<256x48xbf16>, vector<48x128xbf16>, vector<256x128xf32> -> vector<256x128xf32>
    %c0_3 = arith.constant 0 : index
    %c0_4 = arith.constant 0 : index
    %3 = vector.load %arg3[%c0_3, %c0_4] : memref<1x128xf32, #tpu.memory_space<vmem>>, vector<1x128xf32>
    %4 = vector.broadcast %3 : vector<1x128xf32> to vector<256x128xf32>
    %5 = arith.addf %2, %4 : vector<256x128xf32>
    %6 = arith.truncf %5 : vector<256x128xf32> to vector<256x128xbf16>
    %c0_5 = arith.constant 0 : index
    %c0_6 = arith.constant 0 : index
    %7 = vector.load %arg4[%c0_5, %c0_6] : memref<256x128xbf16, #tpu.memory_space<vmem>>, vector<256x128xbf16>
    tpu.vector_store %arg4[%c0_5, %c0_6], %6 {strides = array<i32>} : memref<256x128xbf16, #tpu.memory_space<vmem>>, vector<256x128xbf16>,
    return
  }
  func.func @transform_0(%arg0: i32) -> (i32, i32) {
    %c0_i32 = arith.constant 0 : i32
    %c0_i32_0 = arith.constant 0 : i32
    return %arg0, %c0_i32 : i32, i32
  }
  func.func @transform_1(%arg0: i32) -> (i32, i32) {
    %c0_i32 = arith.constant 0 : i32
    %c0_i32_0 = arith.constant 0 : i32
    %c0_i32_1 = arith.constant 0 : i32
    return %c0_i32, %c0_i32_0 : i32, i32
  }
  func.func @transform_2(%arg0: i32) -> (i32, i32) {
    %c0_i32 = arith.constant 0 : i32
    %c0_i32_0 = arith.constant 0 : i32
    %c0_i32_1 = arith.constant 0 : i32
    return %c0_i32, %c0_i32_0 : i32, i32
  }
  func.func @transform_3(%arg0: i32) -> (i32, i32) {
    %c0_i32 = arith.constant 0 : i32
    %c0_i32_0 = arith.constant 0 : i32
    return %arg0, %c0_i32 : i32, i32
  }
}

</mosaic_0001>

<bundles_post_ra>
// kernel: tpu_custom_call.1
= control target key start
LH: loop header
LB: loop body
LE: loop exit
PB: predicated region body
PF: predicated region fallthrough
CT: control target
= control target key end

     0   :  { %8 = vsyncpa [#allocation3], 0  ;;  %s1382_s0 = inlined_call_operand.vmem [shape: bf16[512,48], index: 0, kind: input, shape index: {}]   ;;  %s1383_s1 = inlined_call_operand.vmem [shape: bf16[48,128], index: 1, kind: input, shape index: {}]   ;;  %s1384_s2 = inlined_call_operand.vmem [shape: f32[1,128], index: 2, kind: input, shape index: {}]   ;;  %s1385_s3 = inlined_call_operand.hbm [shape: bf16[512,128], index: 3, kind: output, shape index: {}]  }
   0x1   :  { %10 = vsyncpa [#allocation3 + $0x1], 0  ;;  %s1178_s12 = smov 0   ;;  %s1180_s13 = smov 0  }
   0x2   :  { %s1182_s14 = smov 0   ;;  %s1184_s15 = smov 0  }
   0x3 LB: > { %s1199_s16 = sadd.s32 4294967295, %s1153_s15   ;;  %s762_s17 = sadd.s32 4294967294, %s1153_s15   ;;  %s1153_s15 = sphi %s1184_s15, %s1391_s15   ;;  %s1149_s14 = sphi %s1182_s14, %s1390_s14   ;;  %s1145_s13 = sphi %s1180_s13, %s1389_s13   ;;  %s1141_s12 = sphi %s1178_s12, %s1388_s12  }
   0x4   : > { %s1203_s18 = sadd.s32 1, %s1153_s15   ;;  %s91_s19 = sadd.s32 1, %s1149_s14 }
   0x5   : > { %s88_s20 = ssub.s32 %s1153_s15, %s1203_s18  ;;  %p101_p0 = scmp.ne.s32.totalorder %s1149_s14, %s1145_s13 }
   0x6   : > { %p89_p1 = scmp.eq.s32.totalorder %s88_s20, 0  ;;  %p102_p2 = scmp.eq.s32.totalorder %s1199_s16, 1 }
   0x7   : > { %p107_p3 = scmp.ne.s32.totalorder %s1145_s13, %s1141_s12  ;;  %p108_p4 = scmp.eq.s32.totalorder %s762_s17, 1 }
   0x8   : > { %s1214_s21 = scalar_select %p89_p1, %s1149_s14, %s91_s19  }
   0x9   : > { %p1216_p5 = por %p102_p2, %p101_p0  ;;  %p1220_p6 = por %p108_p4, %p107_p3 }
   0xa   : > { %p765_p7 = scmp.ge.s32.totalorder %s1153_s15, 1  ;;  %p141_p8 = scmp.lt.s32.totalorder %s1153_s15, 3 }
   0xc   : > { %p142_p9 = pnand %p765_p7, %p141_p8 }
   0xd   : > { %s767_s26 = sshll.u32 (!%p142_p9), %s1199_s16, 5  ;;  %s162_s8 = sand.u32 (!%p142_p9), 1, %s1145_s13  }
   0xe   : > { %145 = sbr.rel (%p142_p9) target bundleno = 273 (0x111), region = 32  ;;  %p166_p10 = scmp.lt.s32.totalorder (!%p142_p9), %s767_s26, 63 }
   0xf   : > { %s766_s11 = sshll.u32 (!%p142_p9), %s162_s8, 7  ;;  %s874_s19 = sshll.u32 (!%p142_p9), %s1199_s16, 11 }
  0x10   : > { %s1289_s17 = scalar_lea.vmem (!%p142_p9), [#allocation2], %s766_s11  ;;  %s1332_s16 = scalar_lea.hbm (!%p142_p9), %s1385_s3, %s874_s19 }
  0x11   : > { %s700_s20 = sshll.u32 (!%p142_p9), %s1289_s17, 4  ;;  %s1155_s28 = smov (!%p142_p9), [#allocation2]   ;;  %s1334_s20 = int_to_ptr.vmem [resolvable:$true] %s700_s20 }
  0x12   : > { %s1093_s27 = scalar_lea.vmem (!%p142_p9), %s1334_s20, 2048  ;;  %s1097_s29 = sshll.u32 (!%p142_p9), %s1155_s28, 4  ;;  %s1098_s29 = int_to_ptr.vmem [resolvable:$false] %s1097_s29 }
  0x13   : > { %v1074_v0 = vld [vmem:[%s1383_s1 + $0x10] sm:$0xff]   ;;  %v1075_v1 = vld [vmem:[%s1383_s1 + $0x8] sm:$0xff]   ;;  %s1393_s26 = smov (!%p166_p10, %s767_s26), 63  ;;  %v1076_v2 = vld [vmem:[%s1383_s1] sm:$0xff]   ;;  %vm316_vm0 = vcmask 392192   ;;  %p1094_p11 = scmp.ne.s32.totalorder %s1334_s20, %s1093_s27 }
  0x14   : > { %989 = vmatprep.subr.bf16.mxu0 %v1074_v0  ;;  %1027 = vmatprep.subr.bf16.mxu1 %v1074_v0  ;;  %s768_s4 = sshll.u32 %s1393_s26, 2  ;;  %v1277_v21 = vld [vmem:[%s1384_s2] ss:$0 sm:$0xff]  ;;  %s1342_s26 = scalar_lea.sflag [#allocation3], %s162_s8 }
  0x15   : > { %990 = vmatpush3.bf16.msra.mxu0 %v1074_v0  ;;  %1030 = vmatpush3.bf16.msra.mxu1 %v1074_v0  ;;  %s1239_s7 = scalar_lea.vmem %s1382_s0, %s768_s4  ;;  %p1095_p12 = pnand %p1094_p11, %p1216_p5 }
  0x16   : > { %991 = vmatprep.subr.bf16.mxu0 %v1075_v1  ;;  %1028 = vmatprep.subr.bf16.mxu1 %v1075_v1  ;;  %v1077_v3 = vld [vmem:[%s1239_s7] sm:$0xff]   ;;  %v1079_v5 = vld [vmem:[%s1239_s7 + $0x8] sm:$0xff]   ;;  %v1081_v7 = vld [vmem:[%s1239_s7 + $0x10] sm:$0xff]   ;;  %s1099_s30 = scalar_lea.vmem %s1098_s29, 4096  ;;  %p1100_p0 = scmp.lt.s32.totalorder %s1334_s20, %s1098_s29 }
  0x17   : > { %v1078_v4 = vld [vmem:[%s1239_s7 + $0x40] sm:$0xff]   ;;  %995 = vmatprep.mubr.msk.bf16.mxu0 %vm316_vm0, %v1077_v3  ;;  %v1080_v6 = vld [vmem:[%s1239_s7 + $0x48] sm:$0xff]   ;;  %v1082_v8 = vld [vmem:[%s1239_s7 + $0x50] sm:$0xff]   ;;  %p1096_p13 = pneg %p1095_p12  ;;  %p1101_p1 = scmp.lt.s32.totalorder %s1099_s30, %s1093_s27 }
  0x18   : > { %1011 = vmatprep.mubr.msk.bf16.mxu1 %vm316_vm0, %v1078_v4  ;;  %v1083_v9 = vld [vmem:[%s1239_s7 + $0x18] sm:$0xff]   ;;  %v1085_v11 = vld [vmem:[%s1239_s7 + $0x20] sm:$0xff]   ;;  %v1087_v13 = vld [vmem:[%s1239_s7 + $0x28] sm:$0xff]  }
  0x19   : > { %992 = vmatpush3.bf16.msra.mxu0 %v1075_v1  ;;  %1031 = vmatpush3.bf16.msra.mxu1 %v1075_v1  ;;  %v1084_v10 = vld [vmem:[%s1239_s7 + $0x58] sm:$0xff]   ;;  %v1086_v12 = vld [vmem:[%s1239_s7 + $0x60] sm:$0xff]   ;;  %v1088_v14 = vld [vmem:[%s1239_s7 + $0x68] sm:$0xff]   ;;  %p1102_p2 = por %p1101_p1, %p1100_p0 }
  0x1a   : > { %993 = vmatprep.subr.bf16.mxu0 %v1076_v2  ;;  %1029 = vmatprep.subr.bf16.mxu1 %v1076_v2  ;;  %v1089_v15 = vld [vmem:[%s1239_s7 + $0x30] sm:$0xff]   ;;  %v1091_v17 = vld [vmem:[%s1239_s7 + $0x38] sm:$0xff]  }
  0x1b   : > { %v1090_v16 = vld [vmem:[%s1239_s7 + $0x70] sm:$0xff]   ;;  %v1092_v18 = vld [vmem:[%s1239_s7 + $0x78] sm:$0xff]   ;;  %p1103_p3 = pnand %p1102_p2, %p1096_p13 }
  0x1d   : > { %994 = vmatpush3.bf16.msra.mxu0 %v1076_v2  ;;  %1032 = vmatpush3.bf16.msra.mxu1 %v1076_v2 }
  0x20   : > { %996 = vmatmul.mubr.msk.bf16.vlgmr.msra.gmra.mxu0 %vm316_vm0, %v1079_v5  ;;  %1012 = vmatmul.mubr.msk.bf16.vlgmr.msra.gmra.mxu1 %vm316_vm0, %v1080_v6 }
  0x21   : > { %999 = vmatprep.mubr.msk.bf16.mxu0 %vm316_vm0, %v1081_v7  ;;  %1015 = vmatprep.mubr.msk.bf16.mxu1 %vm316_vm0, %v1082_v8 }
  0x28   : > { %1000 = vmatmul.mubr.msk.bf16.gmra.mxu0 %vm316_vm0, %v1083_v9  ;;  %1016 = vmatmul.mubr.msk.bf16.gmra.mxu1 %vm316_vm0, %v1084_v10 }
  0x29   : > { %1003 = vmatprep.mubr.msk.bf16.mxu0 %vm316_vm0, %v1085_v11  ;;  %1019 = vmatprep.mubr.msk.bf16.mxu1 %vm316_vm0, %v1086_v12 }
  0x30   : > { %1004 = vmatmul.mubr.msk.bf16.gmra.mxu0 %vm316_vm0, %v1087_v13  ;;  %1020 = vmatmul.mubr.msk.bf16.gmra.mxu1 %vm316_vm0, %v1088_v14 }
  0x31   : > { %1007 = vmatprep.mubr.msk.bf16.mxu0 %vm316_vm0, %v1089_v15  ;;  %1023 = vmatprep.mubr.msk.bf16.mxu1 %vm316_vm0, %v1090_v16 }
  0x38   : > { %1008 = vmatmul.mubr.msk.bf16.gmra.mxu0 %vm316_vm0, %v1091_v17  ;;  %1024 = vmatmul.mubr.msk.bf16.gmra.mxu1 %vm316_vm0, %v1092_v18 }
  0xe0   : > { %v997_v19 = vpop.f32.mrf.mxu0  ;;  %v1013_v20 = vpop.f32.mrf.mxu1 }
  0xe1   : > { %v408_v26 = vadd.f32 %v997_v19, %v1277_v21  ;;  %v472_v27 = vadd.f32 %v1013_v20, %v1277_v21 }
  0xe2   : > { %v399_v22 = vpop.f32.mrf.mxu0  ;;  %v463_v23 = vpop.f32.mrf.mxu1 }
  0xe3   : > { %v400_v30 = vadd.f32 %v1277_v21, %v399_v22  ;;  %v464_v31 = vadd.f32 %v1277_v21, %v463_v23 }
  0xe4   : > { %v998_v24 = vpop.f32.mrf.mxu0  ;;  %v1014_v25 = vpop.f32.mrf.mxu1 }
  0xe5   : > { %v411_v28 = vadd.f32 %v998_v24, %v1277_v21  ;;  %v475_v29 = vadd.f32 %v1014_v25, %v1277_v21 }
  0xe6   : > { %v402_v32 = vpop.f32.mrf.mxu0  ;;  %v466_v33 = vpop.f32.mrf.mxu1 }
  0xe7   : > { %v883_v34 = vpack.c.bf16 %v411_v28, %v408_v26  ;;  %v923_v35 = vpack.c.bf16 %v475_v29, %v472_v27  ;;  %v403_v36 = vadd.f32 %v1277_v21, %v402_v32  ;;  %v467_v37 = vadd.f32 %v1277_v21, %v466_v33 }
  0xe8   : > { %v1001_v38 = vpop.f32.mrf.mxu0  ;;  %v1017_v39 = vpop.f32.mrf.mxu1 }
  0xe9   : > { %955 = vst [vmem:[%s1289_s17 + $0x8] sm:$0xff] %v883_v34   ;;  %963 = vst [vmem:[%s1289_s17 + $0x48] sm:$0xff] %v923_v35   ;;  %v878_v40 = vpack.c.bf16 %v403_v36, %v400_v30  ;;  %v918_v41 = vpack.c.bf16 %v467_v37, %v464_v31  ;;  %v424_v46 = vadd.f32 %v1001_v38, %v1277_v21 }
  0xea   : > { %v415_v42 = vpop.f32.mrf.mxu0  ;;  %v479_v43 = vpop.f32.mrf.mxu1  ;;  %v488_v47 = vadd.f32 %v1017_v39, %v1277_v21 }
  0xeb   : > { %879 = vst [vmem:[%s1289_s17] sm:$0xff] %v878_v40   ;;  %962 = vst [vmem:[%s1289_s17 + $0x40] sm:$0xff] %v918_v41   ;;  %v416_v50 = vadd.f32 %v1277_v21, %v415_v42  ;;  %v480_v51 = vadd.f32 %v1277_v21, %v479_v43 }
  0xec   : > { %v1002_v44 = vpop.f32.mrf.mxu0  ;;  %v1018_v45 = vpop.f32.mrf.mxu1 }
  0xed   : > { %v427_v48 = vadd.f32 %v1002_v44, %v1277_v21  ;;  %v491_v49 = vadd.f32 %v1018_v45, %v1277_v21 }
  0xee   : > { %v418_v52 = vpop.f32.mrf.mxu0  ;;  %v482_v53 = vpop.f32.mrf.mxu1 }
  0xef   : > { %v893_v54 = vpack.c.bf16 %v427_v48, %v424_v46  ;;  %v933_v55 = vpack.c.bf16 %v491_v49, %v488_v47  ;;  %v419_v56 = vadd.f32 %v1277_v21, %v418_v52  ;;  %v483_v57 = vadd.f32 %v1277_v21, %v482_v53 }
  0xf0   : > { %v1005_v58 = vpop.f32.mrf.mxu0  ;;  %v1021_v59 = vpop.f32.mrf.mxu1 }
  0xf1   : > { %957 = vst [vmem:[%s1289_s17 + $0x18] sm:$0xff] %v893_v54   ;;  %965 = vst [vmem:[%s1289_s17 + $0x58] sm:$0xff] %v933_v55   ;;  %v888_v60 = vpack.c.bf16 %v419_v56, %v416_v50  ;;  %v928_v61 = vpack.c.bf16 %v483_v57, %v480_v51  ;;  %v440_v2 = vadd.f32 %v1005_v58, %v1277_v21 }
  0xf2   : > { %v431_v62 = vpop.f32.mrf.mxu0  ;;  %v495_v63 = vpop.f32.mrf.mxu1  ;;  %v504_v3 = vadd.f32 %v1021_v59, %v1277_v21 }
  0xf3   : > { %956 = vst [vmem:[%s1289_s17 + $0x10] sm:$0xff] %v888_v60   ;;  %964 = vst [vmem:[%s1289_s17 + $0x50] sm:$0xff] %v928_v61   ;;  %v432_v6 = vadd.f32 %v1277_v21, %v431_v62  ;;  %v496_v7 = vadd.f32 %v1277_v21, %v495_v63 }
  0xf4   : > { %v1006_v0 = vpop.f32.mrf.mxu0  ;;  %v1022_v1 = vpop.f32.mrf.mxu1 }
  0xf5   : > { %v443_v4 = vadd.f32 %v1006_v0, %v1277_v21  ;;  %v507_v5 = vadd.f32 %v1022_v1, %v1277_v21 }
  0xf6   : > { %v434_v8 = vpop.f32.mrf.mxu0  ;;  %v498_v9 = vpop.f32.mrf.mxu1 }
  0xf7   : > { %v903_v10 = vpack.c.bf16 %v443_v4, %v440_v2  ;;  %v943_v11 = vpack.c.bf16 %v507_v5, %v504_v3  ;;  %v435_v12 = vadd.f32 %v1277_v21, %v434_v8  ;;  %v499_v13 = vadd.f32 %v1277_v21, %v498_v9 }
  0xf8   : > { %v1009_v14 = vpop.f32.mrf.mxu0  ;;  %v1025_v15 = vpop.f32.mrf.mxu1 }
  0xf9   : > { %959 = vst [vmem:[%s1289_s17 + $0x28] sm:$0xff] %v903_v10   ;;  %967 = vst [vmem:[%s1289_s17 + $0x68] sm:$0xff] %v943_v11   ;;  %v898_v16 = vpack.c.bf16 %v435_v12, %v432_v6  ;;  %v938_v17 = vpack.c.bf16 %v499_v13, %v496_v7  ;;  %v456_v23 = vadd.f32 %v1009_v14, %v1277_v21 }
  0xfa   : > { %v447_v18 = vpop.f32.mrf.mxu0  ;;  %v511_v19 = vpop.f32.mrf.mxu1  ;;  %v520_v24 = vadd.f32 %v1025_v15, %v1277_v21 }
  0xfb   : > { %958 = vst [vmem:[%s1289_s17 + $0x20] sm:$0xff] %v898_v16   ;;  %966 = vst [vmem:[%s1289_s17 + $0x60] sm:$0xff] %v938_v17   ;;  %v448_v27 = vadd.f32 %v1277_v21, %v447_v18  ;;  %v512_v28 = vadd.f32 %v1277_v21, %v511_v19 }
  0xfc   : > { %v1010_v20 = vpop.f32.mrf.mxu0  ;;  %v1026_v22 = vpop.f32.mrf.mxu1 }
  0xfd   : > { %v459_v25 = vadd.f32 %v1010_v20, %v1277_v21  ;;  %v523_v26 = vadd.f32 %v1026_v22, %v1277_v21 }
  0xfe   : > { %v450_v29 = vpop.f32.mrf.mxu0  ;;  %v514_v30 = vpop.f32.mrf.mxu1 }
  0xff   : > { %v913_v31 = vpack.c.bf16 %v459_v25, %v456_v23  ;;  %v953_v32 = vpack.c.bf16 %v523_v26, %v520_v24  ;;  %v451_v33 = vadd.f32 %v1277_v21, %v450_v29  ;;  %v515_v34 = vadd.f32 %v1277_v21, %v514_v30 }
 0x101   : > { %961 = vst [vmem:[%s1289_s17 + $0x38] sm:$0xff] %v913_v31   ;;  %969 = vst [vmem:[%s1289_s17 + $0x78] sm:$0xff] %v953_v32   ;;  %v908_v35 = vpack.c.bf16 %v451_v33, %v448_v27  ;;  %v948_v36 = vpack.c.bf16 %v515_v34, %v512_v28 }
 0x103   : > { %960 = vst [vmem:[%s1289_s17 + $0x30] sm:$0xff] %v908_v35   ;;  %968 = vst [vmem:[%s1289_s17 + $0x70] sm:$0xff] %v948_v36  }
 0x104   : > { %1106 = shalt.err (!%p1103_p3)
}
 0x105   : > { %s1107_s4 = scalar_lea.hbm %s1332_s16, 2048  ;;  %s1111_s7 = scalar_lea.hbm %s1385_s3, 4096 }
 0x106   : > { %p1108_p4 = scmp.ne.s32.totalorder %s1332_s16, %s1107_s4  ;;  %p1112_p9 = scmp.lt.s32.totalorder %s1332_s16, %s1385_s3 }
 0x107   : > { %p1113_p10 = scmp.lt.s32.totalorder %s1111_s7, %s1107_s4 }
 0x108   : > { %p1109_p7 = pnand %p1108_p4, %p1216_p5 }
 0x109   : > { %p1114_p11 = por %p1113_p10, %p1112_p9 }
 0x10a   : > { %p1110_p8 = pneg %p1109_p7 }
 0x10c   : > { %p1115_p12 = pnand %p1114_p11, %p1110_p8 }
 0x10e   : > { %1118 = shalt.err (!%p1115_p12)
}
 0x10f   : > { %s1156_s10 = smov 64   ;;  %s1157_s11 = smov 4  }
 0x110   : > { %1033 = dma.vmem_to_hbm [thread:$0]  (%p1216_p5), %s1334_s20, 2048, %s1332_s16, %s1342_s26, %s1156_s10, %s1156_s10, %s1157_s11  }
 0x111 PF: > { %p1039_p13 = scmp.ge.s32.totalorder %s1153_s15, 2  ;;  %s715_s17 = sand.u32 1, %s1141_s12  }
 0x112   : > { %s716_s19 = scalar_lea.sflag [#allocation3], %s715_s17 }
 0x113   : > { %p1036_p0 = pnand %p1039_p13, %p1220_p6 }
 0x115   : > { %p1037_p1 = pneg %p1036_p0 }
 0x117   : > { %1136 = dma.done.wait (%p1037_p1), %s716_s19, 2048  }
 0x118   : > { %1138 = vsyncadd (%p1037_p1), %s716_s19, 4294965248  ;;  %p13_p2 = scmp.ge.s32.totalorder %s1203_s18, 4   ;;  %s1388_s12 = smov %s1145_s13 }
 0x119   : > { %s1389_s13 = smov %s1149_s14  ;;  %s1390_s14 = smov %s1214_s21 }
 0x11a   : > { %s1391_s15 = smov %s1203_s18  ;;  %15 = sbr.rel (!%p13_p2) target bundleno = 3 (0x3), region = 67 }
 0x11f   :  { %721 = vsyncpa [#allocation3], 1 }
 0x120   :  { %723 = vsyncpa [#allocation3 + $0x1], 1 }

</bundles_post_ra>
